<compile_context>
chip_gen: v7x
topology: tpu7x:2x2x1
jax: 0.10.0
libtpu: 0.0.40
codegen_flags: <defaults>
</compile_context>

<pallas_src>
import jax
import jax.numpy as jnp
from jax.experimental import pallas as pl
from jax.experimental.pallas import tpu as pltpu

EPSILON = 1e-6

_MAX_S_BLK = 2048   # lanes per spatial tile (multiple of 128)
_MAX_N_BLK = 256    # rows per tile (multiple of 8)


def _round_up(x, m):
    return ((x + m - 1) // m) * m


def _iou_loss_kernel(yp_ref, yt_ref, iou_ref, inter_acc, sq_acc):
    # yp_ref / yt_ref: (N_blk, S_blk) VMEM tiles.
    # iou_ref:         (N_blk, 1) per-row IoU output (written once per row-block).
    # inter_acc/sq_acc:(N_blk, 1) VMEM scratch accumulators across the S axis.
    s_idx = pl.program_id(1)

    @pl.when(s_idx == 0)
    def _init():
        inter_acc[...] = jnp.zeros_like(inter_acc)
        sq_acc[...] = jnp.zeros_like(sq_acc)

    yp = yp_ref[...].astype(jnp.float32)
    yt = yt_ref[...].astype(jnp.float32)
    d = yt - yp

    inter_acc[...] += jnp.sum(yt * yp, axis=-1, keepdims=True)
    sq_acc[...] += jnp.sum(d * d, axis=-1, keepdims=True)

    @pl.when(s_idx == pl.num_programs(1) - 1)
    def _finalize():
        inter = inter_acc[...]
        union = sq_acc[...] + inter          # sum(t^2)+sum(p^2)-sum(tp)
        iou_ref[...] = ((inter + EPSILON) / (union + EPSILON)).astype(iou_ref.dtype)


def iou_loss(y_pred, y_true):
    """Pallas equivalent of IoULoss().forward(y_pred, y_true). Returns scalar."""
    assert y_pred.shape == y_true.shape
    B, C, H, W = y_pred.shape
    N, S = B * C, H * W

    # ---- pick lane-dense, VMEM-safe tiles ----------------------------------
    S_pad = _round_up(S, 128)
    if S_pad <= _MAX_S_BLK:
        S_blk = S_pad
    else:
        S_blk = _MAX_S_BLK
        S_pad = _round_up(S, S_blk)

    N_pad = _round_up(N, 8)
    if N_pad <= _MAX_N_BLK:
        N_blk = N_pad
    else:
        N_blk = _MAX_N_BLK
        N_pad = _round_up(N, N_blk)

    # ---- flatten + zero-pad (zeros contribute nothing to the row sums) -----
    yp2 = y_pred.reshape(N, S).astype(jnp.float32)
    yt2 = y_true.reshape(N, S).astype(jnp.float32)
    if (N_pad, S_pad) != (N, S):
        yp2 = jnp.pad(yp2, ((0, N_pad - N), (0, S_pad - S)))
        yt2 = jnp.pad(yt2, ((0, N_pad - N), (0, S_pad - S)))

    grid = (N_pad // N_blk, S_pad // S_blk)

    iou_rows = pl.pallas_call(
        _iou_loss_kernel,
        out_shape=jax.ShapeDtypeStruct((N_pad, 1), jnp.float32),
        grid_spec=pltpu.PrefetchScalarGridSpec(
            num_scalar_prefetch=0,
            grid=grid,
            in_specs=[
                pl.BlockSpec((N_blk, S_blk), lambda i, s: (i, s)),
                pl.BlockSpec((N_blk, S_blk), lambda i, s: (i, s)),
            ],
            out_specs=pl.BlockSpec((N_blk, 1), lambda i, s: (i, 0)),
            scratch_shapes=[
                pltpu.VMEM((N_blk, 1), jnp.float32),
                pltpu.VMEM((N_blk, 1), jnp.float32),
            ],
        ),
        compiler_params=pltpu.CompilerParams(
            dimension_semantics=("parallel", "arbitrary")),
    )(yp2, yt2)

    # Tiny epilogue in plain JAX: mean over the *real* N rows (padded rows
    # sliced off), then 1 - mean_iou.
    iou = iou_rows[:N, 0]
    return 1.0 - jnp.mean(iou)


def _iou_loss_ref(y_pred, y_true):
    # Pure-JAX reference matching the PyTorch module exactly.
    op_sum = lambda x: x.sum(-1).sum(-1)
    inter = op_sum(y_true * y_pred)
    union = op_sum(y_true ** 2) + op_sum(y_pred ** 2) - op_sum(y_true * y_pred)
    iou = (inter + EPSILON) / (union + EPSILON)
    return 1.0 - jnp.mean(iou)


if __name__ == "__main__":
    key = jax.random.PRNGKey(0)
    k1, k2 = jax.random.split(key)
    B, C, H, W = 2, 4, 16, 16
    # Mimic typical segmentation-mask inputs (positive values in [0, 1]).
    y_pred = jax.nn.sigmoid(jax.random.normal(k1, (B, C, H, W), dtype=jnp.float32))
    y_true = (jax.random.uniform(k2, (B, C, H, W)) > 0.5).astype(jnp.float32)

    loss = jax.block_until_ready(iou_loss(y_pred, y_true))
    ref = jax.block_until_ready(_iou_loss_ref(y_pred, y_true))

    assert jnp.allclose(loss, ref, atol=1e-5, rtol=1e-5), (loss, ref)
    print("KERNEL_OK")
</pallas_src>

<mosaic_0001>
module attributes {stable_mosaic.version = 11 : i64} {
  func.func @_iou_loss_kernel(%arg0: i32, %arg1: i32, %arg2: memref<8x256xf32, #tpu.memory_space<vmem>>, %arg3: memref<8x256xf32, #tpu.memory_space<vmem>>, %arg4: memref<8x1xf32, #tpu.memory_space<vmem>>, %arg5: memref<8x1xf32, #tpu.memory_space<vmem>>, %arg6: memref<8x1xf32, #tpu.memory_space<vmem>>) attributes {dimension_semantics = [#tpu.dimension_semantics<parallel>, #tpu.dimension_semantics<arbitrary>], iteration_bounds = array<i64: 1, 1>, scalar_prefetch = 0 : i64, scratch_operands = 2 : i64, tpu.core_type = #tpu.core_type<tc>, window_params = [{transform_indices = @transform_0, window_bounds = array<i64: 8, 256>}, {transform_indices = @transform_1, window_bounds = array<i64: 8, 256>}, {transform_indices = @transform_2, window_bounds = array<i64: 8, 1>}]} {
    %c0_i32 = arith.constant 0 : i32
    %0 = arith.cmpi eq, %arg1, %c0_i32 : i32
    %1 = arith.extui %0 : i1 to i32
    %c0_i32_0 = arith.constant 0 : i32
    %2 = arith.cmpi ne, %1, %c0_i32_0 : i32
    scf.if %2 {
      %cst_15 = arith.constant 0.000000e+00 : f32
      %21 = vector.broadcast %cst_15 : f32 to vector<8x1xf32>
      %c0_16 = arith.constant 0 : index
      %c0_17 = arith.constant 0 : index
      %22 = vector.load %arg5[%c0_16, %c0_17] : memref<8x1xf32, #tpu.memory_space<vmem>>, vector<8x1xf32>
      tpu.vector_store %arg5[%c0_16, %c0_17], %21 {strides = array<i32>} : memref<8x1xf32, #tpu.memory_space<vmem>>, vector<8x1xf32>,
      %cst_18 = arith.constant 0.000000e+00 : f32
      %23 = vector.broadcast %cst_18 : f32 to vector<8x1xf32>
      %c0_19 = arith.constant 0 : index
      %c0_20 = arith.constant 0 : index
      %24 = vector.load %arg6[%c0_19, %c0_20] : memref<8x1xf32, #tpu.memory_space<vmem>>, vector<8x1xf32>
      tpu.vector_store %arg6[%c0_19, %c0_20], %23 {strides = array<i32>} : memref<8x1xf32, #tpu.memory_space<vmem>>, vector<8x1xf32>,
    } else {
    }
    %c0 = arith.constant 0 : index
    %c0_1 = arith.constant 0 : index
    %3 = vector.load %arg2[%c0, %c0_1] : memref<8x256xf32, #tpu.memory_space<vmem>>, vector<8x256xf32>
    %c0_2 = arith.constant 0 : index
    %c0_3 = arith.constant 0 : index
    %4 = vector.load %arg3[%c0_2, %c0_3] : memref<8x256xf32, #tpu.memory_space<vmem>>, vector<8x256xf32>
    %5 = arith.subf %4, %3 : vector<8x256xf32>
    %c0_4 = arith.constant 0 : index
    %c0_5 = arith.constant 0 : index
    %6 = vector.load %arg5[%c0_4, %c0_5] : memref<8x1xf32, #tpu.memory_space<vmem>>, vector<8x1xf32>
    %7 = arith.mulf %4, %3 : vector<8x256xf32>
    %cst = arith.constant dense<0.000000e+00> : vector<8xf32>
    %8 = vector.multi_reduction <add>, %7, %cst [1] : vector<8x256xf32> to vector<8xf32>
    %9 = vector.shape_cast %8 : vector<8xf32> to vector<8x1xf32>
    %10 = arith.addf %6, %9 : vector<8x1xf32>
    %c0_6 = arith.constant 0 : index
    %c0_7 = arith.constant 0 : index
    %11 = vector.load %arg5[%c0_6, %c0_7] : memref<8x1xf32, #tpu.memory_space<vmem>>, vector<8x1xf32>
    tpu.vector_store %arg5[%c0_6, %c0_7], %10 {strides = array<i32>} : memref<8x1xf32, #tpu.memory_space<vmem>>, vector<8x1xf32>,
    %c0_8 = arith.constant 0 : index
    %c0_9 = arith.constant 0 : index
    %12 = vector.load %arg6[%c0_8, %c0_9] : memref<8x1xf32, #tpu.memory_space<vmem>>, vector<8x1xf32>
    %13 = arith.mulf %5, %5 : vector<8x256xf32>
    %cst_10 = arith.constant dense<0.000000e+00> : vector<8xf32>
    %14 = vector.multi_reduction <add>, %13, %cst_10 [1] : vector<8x256xf32> to vector<8xf32>
    %15 = vector.shape_cast %14 : vector<8xf32> to vector<8x1xf32>
    %16 = arith.addf %12, %15 : vector<8x1xf32>
    %c0_11 = arith.constant 0 : index
    %c0_12 = arith.constant 0 : index
    %17 = vector.load %arg6[%c0_11, %c0_12] : memref<8x1xf32, #tpu.memory_space<vmem>>, vector<8x1xf32>
    tpu.vector_store %arg6[%c0_11, %c0_12], %16 {strides = array<i32>} : memref<8x1xf32, #tpu.memory_space<vmem>>, vector<8x1xf32>,
    %c0_i32_13 = arith.constant 0 : i32
    %18 = arith.cmpi eq, %arg1, %c0_i32_13 : i32
    %19 = arith.extui %18 : i1 to i32
    %c0_i32_14 = arith.constant 0 : i32
    %20 = arith.cmpi ne, %19, %c0_i32_14 : i32
    scf.if %20 {
      %c0_15 = arith.constant 0 : index
      %c0_16 = arith.constant 0 : index
      %21 = vector.load %arg5[%c0_15, %c0_16] : memref<8x1xf32, #tpu.memory_space<vmem>>, vector<8x1xf32>
      %c0_17 = arith.constant 0 : index
      %c0_18 = arith.constant 0 : index
      %22 = vector.load %arg6[%c0_17, %c0_18] : memref<8x1xf32, #tpu.memory_space<vmem>>, vector<8x1xf32>
      %23 = arith.addf %22, %21 : vector<8x1xf32>
      %cst_19 = arith.constant 9.99999997E-7 : f32
      %24 = vector.broadcast %cst_19 : f32 to vector<8x1xf32>
      %25 = arith.addf %21, %24 : vector<8x1xf32>
      %cst_20 = arith.constant 9.99999997E-7 : f32
      %26 = vector.broadcast %cst_20 : f32 to vector<8x1xf32>
      %27 = arith.addf %23, %26 : vector<8x1xf32>
      %28 = arith.divf %25, %27 : vector<8x1xf32>
      %c0_21 = arith.constant 0 : index
      %c0_22 = arith.constant 0 : index
      %29 = vector.load %arg4[%c0_21, %c0_22] : memref<8x1xf32, #tpu.memory_space<vmem>>, vector<8x1xf32>
      tpu.vector_store %arg4[%c0_21, %c0_22], %28 {strides = array<i32>} : memref<8x1xf32, #tpu.memory_space<vmem>>, vector<8x1xf32>,
    } else {
    }
    return
  }
  func.func @transform_0(%arg0: i32, %arg1: i32) -> (i32, i32) {
    %c0_i32 = arith.constant 0 : i32
    return %arg0, %arg1 : i32, i32
  }
  func.func @transform_1(%arg0: i32, %arg1: i32) -> (i32, i32) {
    %c0_i32 = arith.constant 0 : i32
    return %arg0, %arg1 : i32, i32
  }
  func.func @transform_2(%arg0: i32, %arg1: i32) -> (i32, i32) {
    %c0_i32 = arith.constant 0 : i32
    %c0_i32_0 = arith.constant 0 : i32
    return %arg0, %c0_i32 : i32, i32
  }
}

</mosaic_0001>

<bundles_post_ra>
// kernel: tpu_custom_call.1
= control target key start
LH: loop header
LB: loop body
LE: loop exit
PB: predicated region body
PF: predicated region fallthrough
CT: control target
= control target key end

     0   :  { %7 = vsyncpa [#allocation5], 0  ;;  %s185_s0 = inlined_call_operand.hbm [shape: f32[8,256], index: 0, kind: input, shape index: {}]   ;;  %s186_s1 = inlined_call_operand.hbm [shape: f32[8,256], index: 1, kind: input, shape index: {}]   ;;  %s187_s2 = inlined_call_operand.vmem [shape: f32[8,1], index: 2, kind: output, shape index: {}]  }
   0x1   :  { %8 = vsyncpa [#allocation7], 0  ;;  %s135_s9 = smov [#allocation4]   ;;  %s136_s11 = smov [#allocation6]  }
   0x2   :  { %s15_s10 = sshll.u32 %s135_s9, 4  ;;  %s25_s12 = sshll.u32 %s136_s11, 4  ;;  %s16_s10 = int_to_ptr.vmem [resolvable:$true] %s15_s10  ;;  %s26_s12 = int_to_ptr.vmem [resolvable:$true] %s25_s12 }
   0x3   :  { %s87_s15 = scalar_lea.hbm %s185_s0, 256 }
   0x4   :  { %p88_p0 = scmp.ne.s32.totalorder %s185_s0, %s87_s15  ;;  %p91_p1 = scmp.lt.u32.totalorder %s87_s15, %s185_s0 }
   0x6   :  { %p93_p2 = pnand %p91_p1, %p88_p0 }
   0x8   :  { %96 = shalt.err (!%p93_p2)
}
   0x9   :  { %s97_s20 = scalar_lea.vmem %s16_s10, 256  ;;  %p102_p4 = scmp.lt.s32.totalorder %s16_s10, %s16_s10 }
   0xa   :  { %p98_p3 = scmp.ne.s32.totalorder %s16_s10, %s97_s20  ;;  %p103_p5 = scmp.lt.s32.totalorder %s97_s20, %s97_s20 }
   0xc   :  { %p104_p6 = por %p103_p5, %p102_p4 }
   0xe   :  { %p105_p7 = pnand %p104_p6, %p98_p3 }
  0x10   :  { %108 = shalt.err (!%p105_p7)
}
  0x11   :  { %18 = dma.hbm_to_vmem [thread:$0]  %s185_s0, 256, %s16_s10, [#allocation5]  }
  0x12   :  { %s109_s25 = scalar_lea.hbm %s186_s1, 256 }
  0x13   :  { %p110_p8 = scmp.ne.s32.totalorder %s186_s1, %s109_s25  ;;  %p113_p9 = scmp.lt.u32.totalorder %s109_s25, %s186_s1 }
  0x15   :  { %p115_p10 = pnand %p113_p9, %p110_p8 }
  0x17   :  { %118 = shalt.err (!%p115_p10)
}
  0x18   :  { %s119_s30 = scalar_lea.vmem %s26_s12, 256  ;;  %p124_p12 = scmp.lt.s32.totalorder %s26_s12, %s26_s12 }
  0x19   :  { %p120_p11 = scmp.ne.s32.totalorder %s26_s12, %s119_s30  ;;  %p125_p13 = scmp.lt.s32.totalorder %s119_s30, %s119_s30 }
  0x1b   :  { %p126_p0 = por %p125_p13, %p124_p12 }
  0x1d   :  { %p127_p1 = pnand %p126_p0, %p120_p11 }
  0x1f   :  { %130 = shalt.err (!%p127_p1)
}
  0x20   :  { %28 = dma.hbm_to_vmem [thread:$0]  %s186_s1, 256, %s26_s12, [#allocation7]  }
  0x21   :  { %131 = dma.done.wait [#allocation5], 256  }
  0x22   :  { %132 = vsyncadd [#allocation5], 4294967040 }
  0x23   :  { %133 = dma.done.wait [#allocation7], 256  }
  0x24   :  { %134 = vsyncadd [#allocation7], 4294967040  ;;  %vm39_vm0 = vcmask 7168   ;;  %v137_v0 = vmov 0.0   ;;  %v42_v1 = vld [vmem:[#allocation4] sm:$0xff]  ;;  %v43_v2 = vld [vmem:[#allocation4 + $0x8] sm:$0xff] }
  0x25   :  { %40 = vst.msk [vmem:[#allocation2] sm:$0xff] %vm39_vm0, %v137_v0  ;;  %41 = vst.msk [vmem:[#allocation3] sm:$0xff] %vm39_vm0, %v137_v0  ;;  %v44_v3 = vld [vmem:[#allocation6] sm:$0xff]  ;;  %v45_v4 = vld [vmem:[#allocation6 + $0x8] sm:$0xff] }
  0x26   :  { %v49_v5 = vmul.f32 %v44_v3, %v42_v1  ;;  %v46_v6 = vsub.f32 %v44_v3, %v42_v1  ;;  %v50_v7 = vmul.f32 %v45_v4, %v43_v2  ;;  %v47_v8 = vsub.f32 %v45_v4, %v43_v2 }
  0x28   :  { %v58_v9 = vmul.f32 %v46_v6, %v46_v6  ;;  %v51_v10 = vadd.f32 %v50_v7, %v49_v5  ;;  %v59_v11 = vmul.f32 %v47_v8, %v47_v8 }
  0x2a   :  { %52 = vadd.xlane.f32.xlu0 %v51_v10  ;;  %v60_v12 = vadd.f32 %v59_v11, %v58_v9 }
  0x2c   :  { %v48_v13 = vld [vmem:[#allocation2] sm:$0xff]  ;;  %v57_v16 = vld [vmem:[#allocation3] sm:$0xff] }
  0x2e   :  { %61 = vadd.xlane.f32.xlu0 %v60_v12 }
  0xb7   :  { %v53_v14 = vpop.xlane.xlu0 %52 }
  0xb8   :  { %v54_v15 = vadd.f32 %v53_v14, %v48_v13 }
  0xba   :  { %56 = vst.msk [vmem:[#allocation2] sm:$0xff] %vm39_vm0, %v54_v15 }
  0xbb   :  { %v62_v17 = vpop.xlane.xlu0 %61 }
  0xbc   :  { %v63_v18 = vadd.f32 %v62_v17, %v57_v16 }
  0xbe   :  { %64 = vst.msk [vmem:[#allocation3] sm:$0xff] %vm39_vm0, %v63_v18 }
  0xc1   :  { %v68_v19 = vld [vmem:[#allocation2] sm:$0xff] }
  0xc2   :  { %v71_v23 = vadd.f32 1e-06, %v68_v19 }
  0xc5   :  { %v69_v20 = vld [vmem:[#allocation3] sm:$0xff] }
  0xc6   :  { %v70_v21 = vadd.f32 %v69_v20, %v68_v19 }
  0xc8   :  { %v72_v22 = vadd.f32 1e-06, %v70_v21 }
  0xca   :  { %85 = vrcp.f32 %v72_v22 }
  0xd4   :  { %v86_v24 = vpop.eup %85 }
  0xd5   :  { %v74_v25 = vmul.f32 %v86_v24, %v71_v23 }
  0xd7   :  { %75 = vst.msk [vmem:[%s187_s2] sm:$0xff] %vm39_vm0, %v74_v25 }
  0xd8   :  { %80 = vsyncpa [#allocation5], 1 }
  0xd9   :  { %81 = vsyncpa [#allocation7], 1 }

</bundles_post_ra>
